<compile_context>
chip_gen: v5e
topology: v5e:2x2
jax: 0.10.0
libtpu: 0.0.40
codegen_flags: <defaults>
</compile_context>

<pallas_src>
import jax
import jax.numpy as jnp
from jax.experimental import pallas as pl
from jax.experimental.pallas import tpu as pltpu


def _round_up(n, m):
    return ((n + m - 1) // m) * m


def _logreg_kernel(x_ref, w_ref, b_ref, o_ref):
    # x_ref: (TB, F) VMEM   w_ref: (1, F) VMEM   b_ref: (1, 1) SMEM
    # o_ref: (1, TB) VMEM   (lane-dense output row)
    x = x_ref[...]                        # (TB, F) f32
    w = w_ref[...]                        # (1, F) f32, broadcast over sublanes
    z = jnp.sum(x * w, axis=-1)           # VPU mul + XLU lane reduce -> (TB,)
    z = z + b_ref[0, 0]                   # scalar bias read from SMEM
    y = jax.nn.sigmoid(z)                 # logistic -> EUP
    o_ref[...] = y[None, :].astype(o_ref.dtype)


def model_forward(x, weight, bias, *, tb=None):
    """x: (B, F) f32; weight: (1, F) f32 (PyTorch nn.Linear layout); bias: (1,) f32."""
    B, F = x.shape
    if tb is None:
        # Lane-dense tile: multiple of 128; grow to 512 rows once B is large
        # enough to amortize (measured ~85% of HBM roofline at 512-row tiles).
        tb = min(512, _round_up(B, 128))
    num_tiles = pl.cdiv(B, tb)
    b_pad = num_tiles * tb
    if b_pad != B:
        x = jnp.pad(x, ((0, b_pad - B), (0, 0)))

    w = weight.astype(jnp.float32)               # (1, F), stays resident in VMEM
    b = bias.reshape(1, 1).astype(jnp.float32)   # (1, 1) scalar in SMEM

    out = pl.pallas_call(
        _logreg_kernel,
        out_shape=jax.ShapeDtypeStruct((num_tiles, tb), jnp.float32),
        grid=(num_tiles,),
        in_specs=[
            pl.BlockSpec((tb, F), lambda i: (i, 0)),            # stream x tiles
            pl.BlockSpec((1, F), lambda i: (0, 0)),             # weight resident
            pl.BlockSpec(memory_space=pltpu.MemorySpace.SMEM),  # scalar bias
        ],
        out_specs=pl.BlockSpec((1, tb), lambda i: (i, 0)),      # lane-dense rows
        compiler_params=pltpu.CompilerParams(
            dimension_semantics=("parallel",),                  # megacore on v7x
        ),
    )(x, w, b)

    # Free layout plumbing: (num_tiles, TB) -> (B, 1), dropping batch padding.
    return out.reshape(b_pad, 1)[:B]


if __name__ == "__main__":
    n_input_features = 32
    batch = 8

    key = jax.random.PRNGKey(0)
    kx, kw, kb = jax.random.split(key, 3)

    # Deterministic synthetic parameters (shapes match nn.Linear(n_input_features, 1)).
    weight = jax.random.normal(kw, (1, n_input_features), dtype=jnp.float32) * 0.1
    bias = jax.random.normal(kb, (1,), dtype=jnp.float32) * 0.1
    x = jax.random.normal(kx, (batch, n_input_features), dtype=jnp.float32)

    y = model_forward(x, weight, bias)
    jax.block_until_ready(y)

    # Reference check against plain JAX.
    y_ref = jax.nn.sigmoid(x @ weight.T + bias)
    assert y.shape == (batch, 1)
    assert jnp.allclose(y, y_ref, atol=1e-5, rtol=1e-5)

    print("KERNEL_OK")
</pallas_src>

<mosaic_0001>
module attributes {stable_mosaic.version = 11 : i64} {
  func.func @_logreg_kernel(%arg0: i32, %arg1: memref<128x32xf32, #tpu.memory_space<vmem>>, %arg2: memref<1x32xf32, #tpu.memory_space<vmem>>, %arg3: memref<1x1xf32, #tpu.memory_space<smem>>, %arg4: memref<1x128xf32, #tpu.memory_space<vmem>>) attributes {dimension_semantics = [#tpu.dimension_semantics<parallel>], iteration_bounds = array<i64: 1>, scalar_prefetch = 0 : i64, scratch_operands = 0 : i64, tpu.core_type = #tpu.core_type<tc>, window_params = [{transform_indices = @transform_0, window_bounds = array<i64: 128, 32>}, {pipeline_mode = #tpu.pipeline_mode<synchronous>, transform_indices = @transform_1, window_bounds = array<i64: 1, 32>}, {transform_indices = @transform_2, window_bounds = array<i64: 1, 1>}, {transform_indices = @transform_3, window_bounds = array<i64: 1, 128>}]} {
    %c0 = arith.constant 0 : index
    %c0_0 = arith.constant 0 : index
    %0 = vector.load %arg1[%c0, %c0_0] : memref<128x32xf32, #tpu.memory_space<vmem>>, vector<128x32xf32>
    %c0_1 = arith.constant 0 : index
    %c0_2 = arith.constant 0 : index
    %1 = vector.load %arg2[%c0_1, %c0_2] : memref<1x32xf32, #tpu.memory_space<vmem>>, vector<1x32xf32>
    %2 = vector.broadcast %1 : vector<1x32xf32> to vector<128x32xf32>
    %3 = arith.mulf %0, %2 : vector<128x32xf32>
    %cst = arith.constant dense<0.000000e+00> : vector<128xf32>
    %4 = vector.multi_reduction <add>, %3, %cst [1] : vector<128x32xf32> to vector<128xf32>
    %c0_3 = arith.constant 0 : index
    %c0_4 = arith.constant 0 : index
    %5 = memref.load %arg3[%c0_3, %c0_4] : memref<1x1xf32, #tpu.memory_space<smem>>
    %6 = vector.broadcast %5 : f32 to vector<128xf32>
    %7 = arith.addf %4, %6 : vector<128xf32>
    %8 = arith.negf %7 : vector<128xf32>
    %9 = math.exp %8 : vector<128xf32>
    %cst_5 = arith.constant 1.000000e+00 : f32
    %10 = vector.broadcast %cst_5 : f32 to vector<128xf32>
    %11 = arith.addf %10, %9 : vector<128xf32>
    %12 = arith.divf %10, %11 : vector<128xf32>
    %13 = vector.shape_cast %12 : vector<128xf32> to vector<1x128xf32>
    %c0_6 = arith.constant 0 : index
    %c0_7 = arith.constant 0 : index
    %14 = vector.load %arg4[%c0_6, %c0_7] : memref<1x128xf32, #tpu.memory_space<vmem>>, vector<1x128xf32>
    tpu.vector_store %arg4[%c0_6, %c0_7], %13 {strides = array<i32>} : memref<1x128xf32, #tpu.memory_space<vmem>>, vector<1x128xf32>,
    return
  }
  func.func @transform_0(%arg0: i32) -> (i32, i32) {
    %c0_i32 = arith.constant 0 : i32
    %c0_i32_0 = arith.constant 0 : i32
    return %arg0, %c0_i32 : i32, i32
  }
  func.func @transform_1(%arg0: i32) -> (i32, i32) {
    %c0_i32 = arith.constant 0 : i32
    %c0_i32_0 = arith.constant 0 : i32
    %c0_i32_1 = arith.constant 0 : i32
    return %c0_i32, %c0_i32_0 : i32, i32
  }
  func.func @transform_2(%arg0: i32) -> (i32, i32) {
    %c0_i32 = arith.constant 0 : i32
    %c0_i32_0 = arith.constant 0 : i32
    %c0_i32_1 = arith.constant 0 : i32
    return %c0_i32, %c0_i32_0 : i32, i32
  }
  func.func @transform_3(%arg0: i32) -> (i32, i32) {
    %c0_i32 = arith.constant 0 : i32
    %c0_i32_0 = arith.constant 0 : i32
    return %arg0, %c0_i32 : i32, i32
  }
}

</mosaic_0001>

<bundles_post_ra>
// kernel: tpu_custom_call.1
= control target key start
LH: loop header
LB: loop body
LE: loop exit
PB: predicated region body
PF: predicated region fallthrough
CT: control target
= control target key end

     0   :  { %vm52_vm0 = vcmask 261120   ;;  %s1265_s0 = inlined_call_operand.vmem [shape: f32[128,32], index: 0, kind: input, shape index: {}]   ;;  %s1266_s1 = inlined_call_operand.vmem [shape: f32[1,32], index: 1, kind: input, shape index: {}]   ;;  %s1267_s2 = inlined_call_operand.<no memory space> [shape: f32[1,1], index: 2, kind: input, shape index: {}]   ;;  %s1268_s3 = inlined_call_operand.hbm [shape: f32[1,128], index: 3, kind: output, shape index: {}]  }
   0x1   :  { %v20_v0 = vld [vmem:[%s1265_s0 + $0x20] sm:$0xff]  ;;  %v18_v2 = vld [vmem:[%s1265_s0 + $0x10] sm:$0xff]  ;;  %v21_v7 = vld [vmem:[%s1265_s0 + $0x28] sm:$0xff] }
   0x2   :  { %v655_v1 = vld [vmem:[%s1266_s1] ss:$0 sm:$0xff]  ;;  %v19_v8 = vld [vmem:[%s1265_s0 + $0x18] sm:$0xff]  ;;  %v17_v12 = vld [vmem:[%s1265_s0 + $0x8] sm:$0xff] }
   0x3   :  { %v16_v3 = vld [vmem:[%s1265_s0] sm:$0xff]  ;;  %v40_v4 = vmul.f32 %v655_v1, %v20_v0  ;;  %v38_v5 = vmul.f32 %v655_v1, %v18_v2  ;;  %v41_v13 = vmul.f32 %v655_v1, %v21_v7  ;;  %v39_v14 = vmul.f32 %v655_v1, %v19_v8 }
   0x4   :  { %v36_v6 = vmul.f32 %v655_v1, %v16_v3 }
   0x5   :  { %v65_v9 = vsel %vm52_vm0, %v40_v4, 0.0  ;;  %v59_v10 = vsel %vm52_vm0, %v38_v5, 0.0 }
   0x6   :  { %v53_v11 = vsel %vm52_vm0, %v36_v6, 0.0  ;;  %66 = vadd.xlane.f32.xlu2 %v65_v9  ;;  %60 = vadd.xlane.f32.xlu1 %v59_v10 }
   0x7   :  { %54 = vadd.xlane.f32.xlu0 %v53_v11 }
   0x8   :  { %9 = vsyncpa [#allocation4], 0  ;;  %v37_v15 = vmul.f32 %v655_v1, %v17_v12  ;;  %v68_v16 = vsel %vm52_vm0, %v41_v13, 0.0  ;;  %v62_v17 = vsel %vm52_vm0, %v39_v14, 0.0  ;;  %v24_v19 = vld [vmem:[%s1265_s0 + $0x40] sm:$0xff]  ;;  %v23_v20 = vld [vmem:[%s1265_s0 + $0x38] sm:$0xff]  ;;  %v737_v49 = vstv %s1267_s2 }
   0x9   :  { %v22_v21 = vld [vmem:[%s1265_s0 + $0x30] sm:$0xff]  ;;  %v44_v22 = vmul.f32 %v655_v1, %v24_v19  ;;  %v43_v23 = vmul.f32 %v655_v1, %v23_v20  ;;  %v27_v28 = vld [vmem:[%s1265_s0 + $0x58] sm:$0xff]  ;;  %v25_v30 = vld [vmem:[%s1265_s0 + $0x48] sm:$0xff]  ;;  %v439_v14 = vlaneseq  ;;  %s511_s1 = sshll.u32 %s1268_s3, 4  ;;  %s512_s1 = int_to_ptr.hbm [resolvable:$true] %s511_s1 }
   0xa   :  { %v56_v18 = vsel %vm52_vm0, %v37_v15, 0.0  ;;  %v42_v24 = vmul.f32 %v655_v1, %v22_v21  ;;  %v26_v29 = vld [vmem:[%s1265_s0 + $0x50] sm:$0xff]  ;;  %v47_v31 = vmul.f32 %v655_v1, %v27_v28  ;;  %v45_v33 = vmul.f32 %v655_v1, %v25_v30  ;;  %v29_v38 = vld [vmem:[%s1265_s0 + $0x68] sm:$0xff]  ;;  %v28_v39 = vld [vmem:[%s1265_s0 + $0x60] sm:$0xff] }
   0xb   :  { %v77_v25 = vsel %vm52_vm0, %v44_v22, 0.0  ;;  %v74_v26 = vsel %vm52_vm0, %v43_v23, 0.0  ;;  %v46_v32 = vmul.f32 %v655_v1, %v26_v29  ;;  %v30_v37 = vld [vmem:[%s1265_s0 + $0x70] sm:$0xff]  ;;  %v49_v41 = vmul.f32 %v655_v1, %v29_v38  ;;  %v31_v46 = vld [vmem:[%s1265_s0 + $0x78] sm:$0xff]  ;;  %s628_s0 = smov [#allocation3]  }
   0xc   :  { %v71_v27 = vsel %vm52_vm0, %v42_v24, 0.0  ;;  %v86_v34 = vsel %vm52_vm0, %v47_v31, 0.0  ;;  %v80_v36 = vsel %vm52_vm0, %v45_v33, 0.0  ;;  %v50_v40 = vmul.f32 %v655_v1, %v30_v37  ;;  %s509_s2 = sshll.u32 %s628_s0, 4  ;;  %s510_s2 = int_to_ptr.vmem [resolvable:$true] %s509_s2 }
   0xd   :  { %v83_v35 = vsel %vm52_vm0, %v46_v32, 0.0  ;;  %v48_v42 = vmul.f32 %v655_v1, %v28_v39  ;;  %v92_v44 = vsel %vm52_vm0, %v49_v41, 0.0  ;;  %v51_v47 = vmul.f32 %v655_v1, %v31_v46 }
   0xe   :  { %69 = vadd.xlane.f32.xlu2 %v68_v16  ;;  %63 = vadd.xlane.f32.xlu1 %v62_v17  ;;  %v95_v43 = vsel %vm52_vm0, %v50_v40, 0.0  ;;  %v765_v23 = vand.u32 127, %v439_v14 }
   0xf   :  { %57 = vadd.xlane.f32.xlu0 %v56_v18  ;;  %v89_v45 = vsel %vm52_vm0, %v48_v42, 0.0  ;;  %v98_v48 = vsel %vm52_vm0, %v51_v47, 0.0 }
  0x10   :  { %v780_v31 = vadd.s32 4294967264, %v765_v23  ;;  %v783_v32 = vadd.s32 4294967280, %v765_v23  ;;  %v791_v37 = vadd.s32 4294967272, %v765_v23  ;;  %v794_v38 = vadd.s32 4294967288, %v765_v23 }
  0x16   :  { %78 = vadd.xlane.f32.xlu2 %v77_v25  ;;  %75 = vadd.xlane.f32.xlu1 %v74_v26 }
  0x17   :  { %72 = vadd.xlane.f32.xlu0 %v71_v27 }
  0x1e   :  { %87 = vadd.xlane.f32.xlu2 %v86_v34  ;;  %84 = vadd.xlane.f32.xlu1 %v83_v35  ;;  %v788_v34 = vadd.s32 4294967256, %v765_v23 }
  0x1f   :  { %81 = vadd.xlane.f32.xlu0 %v80_v36 }
  0x26   :  { %96 = vadd.xlane.f32.xlu2 %v95_v43  ;;  %93 = vadd.xlane.f32.xlu1 %v92_v44 }
  0x27   :  { %90 = vadd.xlane.f32.xlu0 %v89_v45 }
  0x2f   :  { %99 = vadd.xlane.f32.xlu0 %v98_v48 }
  0x79   :  { %v67_v50 = vpop.xlane.xlu2 %66  ;;  %v61_v51 = vpop.xlane.xlu1 %60 }
  0x7a   :  { %v107_v52 = vadd.f32 %v737_v49, %v67_v50  ;;  %v105_v53 = vadd.f32 %v737_v49, %v61_v51  ;;  %v55_v54 = vpop.xlane.xlu0 %54 }
  0x7b   :  { %v103_v55 = vadd.f32 %v737_v49, %v55_v54 }
  0x7c   :  { %v524_v56 = vmul.f32 -1.442695, %v107_v52  ;;  %v522_v57 = vmul.f32 -1.442695, %v105_v53 }
  0x7d   :  { %v520_v58 = vmul.f32 -1.442695, %v103_v55  ;;  %v813_v55 = vadd.s32 4294967232, %v765_v23 }
  0x7e   :  { %538 = vpow2.f32 %v524_v56  ;;  %v816_v56 = vadd.s32 4294967240, %v765_v23 }
  0x7f   :  { %540 = vpow2.f32 %v522_v57 }
  0x80   :  { %542 = vpow2.f32 %v520_v58 }
  0x81   :  { %v70_v59 = vpop.xlane.xlu2 %69  ;;  %v64_v60 = vpop.xlane.xlu1 %63 }
  0x82   :  { %v108_v61 = vadd.f32 %v737_v49, %v70_v59  ;;  %v106_v62 = vadd.f32 %v737_v49, %v64_v60  ;;  %v58_v63 = vpop.xlane.xlu0 %57 }
  0x83   :  { %v104_v0 = vadd.f32 %v737_v49, %v58_v63 }
  0x84   :  { %v539_v1 = vpop.eup %538  ;;  %v525_v2 = vmul.f32 -1.442695, %v108_v61  ;;  %v523_v5 = vmul.f32 -1.442695, %v106_v62 }
  0x85   :  { %v541_v3 = vpop.eup %540  ;;  %v745_v4 = vadd.f32 1.0, %v539_v1  ;;  %v521_v7 = vmul.f32 -1.442695, %v104_v0 }
  0x86   :  { %v543_v6 = vpop.eup %542  ;;  %544 = vpow2.f32 %v525_v2  ;;  %v747_v8 = vadd.f32 1.0, %v541_v3 }
  0x87   :  { %546 = vrcp.f32 %v745_v4  ;;  %v750_v9 = vadd.f32 1.0, %v543_v6  ;;  %v254_v28 = vand.u32 2147483648, %v745_v4  ;;  %vm248_vm1 = vweird.f32 %v745_v4 }
  0x88   :  { %548 = vpow2.f32 %v523_v5  ;;  %v224_v29 = vand.u32 2147483648, %v747_v8  ;;  %v252_v40 = vand.u32 2147483647, %v745_v4  ;;  %v222_v42 = vand.u32 2147483647, %v747_v8 }
  0x89   :  { %v79_v10 = vpop.xlane.xlu2 %78  ;;  %550 = vpow2.f32 %v521_v7  ;;  %v76_v16 = vpop.xlane.xlu1 %75  ;;  %v194_v43 = vand.u32 2147483648, %v750_v9  ;;  %v803_v47 = vor.u32 1.1754944e-38, %v254_v28  ;;  %v192_v54 = vand.u32 2147483647, %v750_v9 }
  0x8a   :  { %552 = vrcp.f32 %v747_v8  ;;  %v111_v12 = vadd.f32 %v737_v49, %v79_v10  ;;  %v73_v27 = vpop.xlane.xlu0 %72  ;;  %v110_v30 = vadd.f32 %v737_v49, %v76_v16  ;;  %v805_v48 = vor.u32 1.1754944e-38, %v224_v29 }
  0x8b   :  { %554 = vrcp.f32 %v750_v9  ;;  %v109_v39 = vadd.f32 %v737_v49, %v73_v27  ;;  %vm218_vm3 = vweird.f32 %v747_v8  ;;  %vm188_vm4 = vweird.f32 %v750_v9 }
  0x8c   :  { %v545_v11 = vpop.eup %544  ;;  %v528_v15 = vmul.f32 -1.442695, %v111_v12  ;;  %v527_v51 = vmul.f32 -1.442695, %v110_v30  ;;  %v827_v62 = vor.u32 1.1754944e-38, %v194_v43  ;;  %vm853_vm7 = vcmp.eq.f32.partialorder %v192_v54, 8.507059e+37 }
  0x8d   :  { %v755_v13 = vpop.eup %546  ;;  %v757_v18 = vadd.f32 1.0, %v545_v11  ;;  %v526_v60 = vmul.f32 -1.442695, %v109_v39  ;;  %vm862_vm10 = vcmp.eq.f32.partialorder %v252_v40, 8.507059e+37  ;;  %vm877_vm14 = vcmp.eq.f32.partialorder %v222_v42, 8.507059e+37 }
  0x8e   :  { %v549_v17 = vpop.eup %548  ;;  %556 = vpow2.f32 %v528_v15  ;;  %v244_v25 = vmul.f32 %v755_v13, %v745_v4  ;;  %vm249_vm2 = vweird.f32 %v755_v13 }
  0x8f   :  { %v551_v19 = vpop.eup %550  ;;  %v759_v20 = vadd.f32 1.0, %v549_v17  ;;  %558 = vrcp.f32 %v757_v18  ;;  %v269_v59 = vand.u32 2147483648, %v757_v18  ;;  %v267_v0 = vand.u32 2147483647, %v757_v18  ;;  %vm873_vm13 = vmor %vm248_vm1, %vm249_vm2 }
  0x90   :  { %v761_v21 = vpop.eup %552  ;;  %v763_v22 = vadd.f32 1.0, %v551_v19  ;;  %v245_v36 = vsub.f32 1.0, %v244_v25  ;;  %vm263_vm8 = vweird.f32 %v757_v18  ;;  %vm444_vm1 = vcmask 130112  }
  0x91   :  { %v767_v24 = vpop.eup %554  ;;  %v214_v26 = vmul.f32 %v761_v21, %v747_v8  ;;  %560 = vrcp.f32 %v759_v20  ;;  %v88_v44 = vpop.xlane.xlu2 %87  ;;  %vm219_vm5 = vweird.f32 %v761_v21  ;;  %v842_v10 = vor.u32 1.1754944e-38, %v269_v59 }
  0x92   :  { %562 = vrcp.f32 %v763_v22  ;;  %v184_v33 = vmul.f32 %v767_v24, %v750_v9  ;;  %v85_v45 = vpop.xlane.xlu1 %84  ;;  %v246_v58 = vmul.f32 %v755_v13, %v245_v36  ;;  %vm189_vm6 = vweird.f32 %v767_v24  ;;  %v82_v6 = vpop.xlane.xlu0 %81 }
  0x93   :  { %v215_v41 = vsub.f32 1.0, %v214_v26  ;;  %v237_v11 = vand.u32 2147483647, %v759_v20  ;;  %v239_v14 = vand.u32 2147483648, %v759_v20  ;;  %v114_v16 = vadd.f32 %v737_v49, %v88_v44  ;;  %vm895_vm15 = vmor %vm188_vm4, %vm189_vm6 }
  0x94   :  { %v557_v35 = vpop.eup %556  ;;  %v185_v53 = vsub.f32 1.0, %v184_v33  ;;  %v840_v7 = vadd.f32 %v755_v13, %v246_v58  ;;  %vm203_vm9 = vweird.f32 %v763_v22  ;;  %v207_v25 = vand.u32 2147483647, %v763_v22  ;;  %vm920_vm4 = vmor %vm218_vm3, %vm219_vm5 }
  0x95   :  { %v801_v46 = vpop.eup %558  ;;  %v807_v50 = vadd.f32 1.0, %v557_v35  ;;  %v216_v61 = vmul.f32 %v761_v21, %v215_v41  ;;  %v113_v26 = vadd.f32 %v737_v49, %v85_v45  ;;  %v112_v27 = vadd.f32 %v737_v49, %v82_v6 }
  0x96   :  { %v186_v1 = vmul.f32 %v767_v24, %v185_v53  ;;  %v259_v2 = vmul.f32 %v801_v46, %v757_v18  ;;  %vm233_vm11 = vweird.f32 %v759_v20  ;;  %v531_v45 = vmul.f32 -1.442695, %v114_v16 }
  0x97   :  { %v809_v52 = vpop.eup %560  ;;  %564 = vrcp.f32 %v807_v50  ;;  %v846_v12 = vadd.f32 %v761_v21, %v216_v61  ;;  %v251_v4 = vsel %vm873_vm13, %v755_v13, %v840_v7  ;;  %v209_v53 = vand.u32 2147483648, %v763_v22 }
  0x98   :  { %v818_v57 = vpop.eup %562  ;;  %566 = vpow2.f32 %v527_v51  ;;  %v229_v3 = vmul.f32 %v809_v52, %v759_v20  ;;  %v187_v29 = vadd.f32 %v767_v24, %v186_v1  ;;  %v260_v30 = vsub.f32 1.0, %v259_v2 }
  0x99   :  { %v199_v63 = vmul.f32 %v818_v57, %v763_v22  ;;  %568 = vpow2.f32 %v526_v60  ;;  %vm204_vm12 = vweird.f32 %v818_v57  ;;  %v97_v35 = vpop.xlane.xlu2 %96  ;;  %v530_v51 = vmul.f32 -1.442695, %v113_v26 }
  0x9a   :  { %v230_v33 = vsub.f32 1.0, %v229_v3  ;;  %v94_v36 = vpop.xlane.xlu1 %93  ;;  %v529_v42 = vmul.f32 -1.442695, %v112_v27  ;;  %vm264_vm0 = vweird.f32 %v801_v46  ;;  %570 = vpow2.f32 %v531_v45  ;;  %vm911_vm2 = vmor %vm203_vm9, %vm204_vm12  ;;  %v91_v7 = vpop.xlane.xlu0 %90 }
  0x9b   :  { %v200_v5 = vsub.f32 1.0, %v199_v63  ;;  %v117_v60 = vadd.f32 %v737_v49, %v97_v35  ;;  %v116_v13 = vadd.f32 %v737_v49, %v94_v36  ;;  %v191_v61 = vsel %vm895_vm15, %v767_v24, %v187_v29 }
  0x9c   :  { %v261_v63 = vmul.f32 %v801_v46, %v260_v30  ;;  %v231_v1 = vmul.f32 %v809_v52, %v230_v33  ;;  %v210_v6 = vor.u32 1.1754944e-38, %v209_v53  ;;  %vm933_vm3 = vcmp.eq.f32.partialorder %v267_v0, 8.507059e+37 }
  0x9d   :  { %v201_v15 = vmul.f32 %v818_v57, %v200_v5  ;;  %v851_v17 = vpop.eup %564  ;;  %v221_v5 = vsel %vm920_vm4, %v761_v21, %v846_v12  ;;  %v533_v8 = vmul.f32 -1.442695, %v116_v13  ;;  %vm234_vm5 = vweird.f32 %v809_v52 }
  0x9e   :  { %v567_v39 = vpop.eup %566  ;;  %v304_v44 = vmul.f32 %v851_v17, %v807_v50  ;;  %vm448_vm6 = vcmask 195712   ;;  %vm208_vm9 = vcmp.eq.f32.partialorder %v207_v25, 8.507059e+37  ;;  %v196_v16 = vsel %vm853_vm7, %v827_v62, %v191_v61  ;;  %vm966_vm7 = vmor %vm263_vm8, %vm264_vm0 }
  0x9f   :  { %v202_v43 = vadd.f32 %v818_v57, %v201_v15  ;;  %v889_v54 = vadd.f32 1.0, %v567_v39  ;;  %v569_v58 = vpop.eup %568  ;;  %v262_v21 = vadd.f32 %v801_v46, %v261_v63  ;;  %v232_v12 = vadd.f32 %v809_v52, %v231_v1 }
  0xa0   :  { %v305_v3 = vsub.f32 1.0, %v304_v44  ;;  %v927_v22 = vadd.f32 1.0, %v569_v58  ;;  %v571_v0 = vpop.eup %570  ;;  %v947_v27 = vsel %vm862_vm10, %v803_v47, %v251_v4  ;;  %vm951_vm12 = vcmp.eq.f32.partialorder %v237_v11, 8.507059e+37 }
  0xa1   :  { %572 = vrcp.f32 %v889_v54  ;;  %v206_v2 = vsel %vm911_vm2, %v818_v57, %v202_v43  ;;  %v534_v57 = vmul.f32 -1.442695, %v117_v60  ;;  %v115_v62 = vadd.f32 %v737_v49, %v91_v7 }
  0xa2   :  { %574 = vpow2.f32 %v530_v51  ;;  %v211_v26 = vsel %vm208_vm9, %v210_v6, %v206_v2  ;;  %v306_v19 = vmul.f32 %v851_v17, %v305_v3  ;;  %v226_v30 = vsel %vm877_vm14, %v805_v48, %v221_v5  ;;  %vm978_vm14 = vmor %vm233_vm11, %vm234_vm5 }
  0xa3   :  { %576 = vpow2.f32 %v529_v42  ;;  %vm452_vm10 = vcmask 261312   ;;  %vm308_vm13 = vweird.f32 %v807_v50  ;;  %v971_v11 = vadd.f32 1.0, %v571_v0 }
  0xa4   :  { %578 = vrcp.f32 %v927_v22  ;;  %v441_v33 = vperm.slane %v196_v16, %v765_v23  ;;  %v443_v18 = vperm.slane %v211_v26, %v794_v38  ;;  %v532_v35 = vmul.f32 -1.442695, %v115_v62 }
  0xa5   :  { %580 = vpow2.f32 %v533_v8  ;;  %v266_v39 = vsel %vm966_vm7, %v801_v46, %v262_v21  ;;  %v236_v40 = vsel %vm978_vm14, %v809_v52, %v232_v12  ;;  %vm309_vm8 = vweird.f32 %v851_v17 }
  0xa6   :  { %582 = vpow2.f32 %v534_v57  ;;  %v307_v38 = vadd.f32 %v851_v17, %v306_v19  ;;  %v240_v46 = vor.u32 1.1754944e-38, %v239_v14  ;;  %v314_v52 = vand.u32 2147483648, %v807_v50  ;;  %vm1020_vm11 = vmor %vm308_vm13, %vm309_vm8 }
  0xa7   :  { %v957_v29 = vpop.eup %572  ;;  %584 = vrcp.f32 %v971_v11  ;;  %v447_v4 = vperm.slane %v226_v30, %v783_v32  ;;  %v445_v53 = vsel %vm444_vm1, %v443_v18, %v441_v33  ;;  %v312_v42 = vand.u32 2147483647, %v807_v50  ;;  %v100_v33 = vpop.xlane.xlu0 %99 }
  0xa8   :  { %v575_v28 = vpop.eup %574  ;;  %v289_v41 = vmul.f32 %v957_v29, %v889_v54  ;;  %586 = vpow2.f32 %v532_v35  ;;  %v1012_v20 = vsel %vm933_vm3, %v842_v10, %v266_v39  ;;  %v241_v14 = vsel %vm951_vm12, %v240_v46, %v236_v40 }
  0xa9   :  { %v577_v36 = vpop.eup %576  ;;  %v996_v44 = vadd.f32 1.0, %v575_v28  ;;  %v455_v13 = vperm.slane %v947_v27, %v780_v31  ;;  %v311_v10 = vsel %vm1020_vm11, %v851_v17, %v307_v38  ;;  %v299_v61 = vand.u32 2147483648, %v889_v54 }
  0xaa   :  { %v992_v43 = vpop.eup %578  ;;  %v998_v45 = vadd.f32 1.0, %v577_v36  ;;  %v290_v59 = vsub.f32 1.0, %v289_v41  ;;  %v449_v50 = vsel %vm448_vm6, %v447_v4, %v445_v53  ;;  %v315_v1 = vor.u32 1.1754944e-38, %v314_v52 }
  0xab   :  { %v274_v51 = vmul.f32 %v992_v43, %v927_v22  ;;  %588 = vrcp.f32 %v996_v44  ;;  %v581_v58 = vpop.eup %580  ;;  %v297_v9 = vand.u32 2147483647, %v889_v54  ;;  %v459_v3 = vperm.slane %v1012_v20, %v788_v34 }
  0xac   :  { %590 = vrcp.f32 %v998_v45  ;;  %v583_v60 = vpop.eup %582  ;;  %v1033_v24 = vadd.f32 1.0, %v581_v58  ;;  %v451_v5 = vperm.slane %v241_v14, %v791_v37  ;;  %vm313_vm15 = vcmp.eq.f32.partialorder %v312_v42, 8.507059e+37 }
  0xad   :  { %v275_v63 = vsub.f32 1.0, %v274_v51  ;;  %v1035_v2 = vpop.eup %584  ;;  %v1041_v17 = vadd.s32 4294967248, %v765_v23  ;;  %v1043_v8 = vsel %vm313_vm15, %v315_v1, %v311_v10  ;;  %v291_v7 = vmul.f32 %v957_v29, %v290_v59 }
  0xae   :  { %v587_v6 = vpop.eup %586  ;;  %v1047_v15 = vadd.s32 4294967224, %v765_v23  ;;  %v1049_v57 = vadd.f32 1.0, %v583_v60  ;;  %v1054_v21 = vsel %vm452_vm10, %v451_v5, %v449_v50  ;;  %vm293_vm0 = vweird.f32 %v889_v54 }
  0xaf   :  { %v300_v37 = vor.u32 1.1754944e-38, %v299_v61  ;;  %v276_v12 = vmul.f32 %v992_v43, %v275_v63  ;;  %vm1060_vm1 = vcmp.eq.f32.partialorder %v297_v9, 8.507059e+37  ;;  %v282_v25 = vand.u32 2147483647, %v927_v22 }
  0xb0   :  { %v284_v19 = vand.u32 2147483648, %v927_v22  ;;  %592 = vrcp.f32 %v1033_v24  ;;  %v471_v30 = vperm.slane %v1043_v8, %v813_v55  ;;  %vm278_vm2 = vweird.f32 %v927_v22 }
  0xb1   :  { %v1051_v16 = vpop.eup %588  ;;  %v359_v47 = vand.u32 2147483648, %v971_v11  ;;  %v292_v48 = vadd.f32 %v957_v29, %v291_v7  ;;  %vm294_vm4 = vweird.f32 %v957_v29  ;;  %vm279_vm3 = vweird.f32 %v992_v43 }
  0xb2   :  { %v1058_v26 = vpop.eup %590  ;;  %v334_v62 = vmul.f32 %v1051_v16, %v996_v44  ;;  %594 = vrcp.f32 %v1049_v57  ;;  %v277_v18 = vadd.f32 %v992_v43, %v276_v12  ;;  %v349_v35 = vmul.f32 %v1035_v2, %v971_v11  ;;  %vm1091_vm6 = vmor %vm293_vm0, %vm294_vm4 }
  0xb3   :  { %v319_v28 = vmul.f32 %v1058_v26, %v998_v45  ;;  %v1082_v39 = vadd.f32 1.0, %v587_v6  ;;  %vm1084_vm5 = vcmp.eq.f32.partialorder %v282_v25, 8.507059e+37  ;;  %v285_v41 = vor.u32 1.1754944e-38, %v284_v19  ;;  %vm1109_vm9 = vmor %vm278_vm2, %vm279_vm3 }
  0xb4   :  { %v335_v38 = vsub.f32 1.0, %v334_v62  ;;  %v118_v46 = vadd.f32 %v737_v49, %v100_v33  ;;  %v357_v51 = vand.u32 2147483647, %v971_v11  ;;  %v1096_v4 = vor.u32 1.1754944e-38, %v359_v47 }
  0xb5   :  { %v320_v36 = vsub.f32 1.0, %v319_v28  ;;  %v344_v53 = vand.u32 2147483648, %v996_v44  ;;  %v296_v49 = vsel %vm1091_vm6, %v957_v29, %v292_v48  ;;  %v342_v14 = vand.u32 2147483647, %v996_v44 }
  0xb6   :  { %v1100_v58 = vpop.eup %592  ;;  %v327_v32 = vand.u32 2147483647, %v998_v45  ;;  %596 = vrcp.f32 %v1082_v39  ;;  %v281_v59 = vsel %vm1109_vm9, %v992_v43, %v277_v18  ;;  %v350_v60 = vsub.f32 1.0, %v349_v35 }
  0xb7   :  { %v321_v42 = vmul.f32 %v1058_v26, %v320_v36  ;;  %v329_v29 = vand.u32 2147483648, %v998_v45  ;;  %v379_v22 = vmul.f32 %v1100_v58, %v1033_v24  ;;  %v336_v61 = vmul.f32 %v1051_v16, %v335_v38 }
  0xb8   :  { %v1122_v10 = vpop.eup %594  ;;  %vm338_vm12 = vweird.f32 %v996_v44  ;;  %vm323_vm7 = vweird.f32 %v998_v45  ;;  %v535_v63 = vmul.f32 -1.442695, %v118_v46  ;;  %v301_v50 = vsel %vm1060_vm1, %v300_v37, %v296_v49 }
  0xb9   :  { %v345_v1 = vor.u32 1.1754944e-38, %v344_v53  ;;  %v322_v43 = vadd.f32 %v1058_v26, %v321_v42  ;;  %vm324_vm10 = vweird.f32 %v1058_v26  ;;  %v286_v9 = vsel %vm1084_vm5, %v285_v41, %v281_v59 }
  0xba   :  { %vm353_vm13 = vweird.f32 %v971_v11  ;;  %vm354_vm14 = vweird.f32 %v1035_v2  ;;  %vm1135_vm8 = vcmp.eq.f32.partialorder %v327_v32, 8.507059e+37  ;;  %598 = vpow2.f32 %v535_v63  ;;  %vm1153_vm0 = vmor %vm323_vm7, %vm324_vm10 }
  0xbb   :  { %v351_v6 = vmul.f32 %v1035_v2, %v350_v60  ;;  %vm1140_vm11 = vcmp.eq.f32.partialorder %v342_v14, 8.507059e+37  ;;  %v330_v37 = vor.u32 1.1754944e-38, %v329_v29  ;;  %v394_v12 = vmul.f32 %v1122_v10, %v1049_v57 }
  0xbc   :  { %v380_v0 = vsub.f32 1.0, %v379_v22  ;;  %v597_v25 = vpop.eup %596  ;;  %v467_v19 = vperm.slane %v301_v50, %v816_v56  ;;  %v337_v62 = vadd.f32 %v1051_v16, %v336_v61  ;;  %vm339_vm15 = vweird.f32 %v1051_v16 }
  0xbd   :  { %vm456_vm1 = vcmask 326912   ;;  %v463_v28 = vperm.slane %v286_v9, %v1041_v17  ;;  %v326_v33 = vsel %vm1153_vm0, %v1058_v26, %v322_v43  ;;  %v364_v56 = vmul.f32 %v597_v25, %v1082_v39  ;;  %vm1171_vm5 = vmor %vm338_vm12, %vm339_vm15 }
  0xbe   :  { %vm460_vm2 = vcmask 392512   ;;  %v404_v48 = vand.u32 2147483648, %v1049_v57  ;;  %vm383_vm4 = vweird.f32 %v1033_v24  ;;  %v457_v45 = vsel %vm456_vm1, %v455_v13, %v1054_v21  ;;  %vm1210_vm1 = vmor %vm353_vm13, %vm354_vm14 }
  0xbf   :  { %vm464_vm3 = vcmask 458112   ;;  %v352_v18 = vadd.f32 %v1035_v2, %v351_v6  ;;  %v395_v26 = vsub.f32 1.0, %v394_v12  ;;  %v381_v35 = vmul.f32 %v1100_v58, %v380_v0 }
  0xc0   :  { %v365_v36 = vsub.f32 1.0, %v364_v56  ;;  %v599_v40 = vpop.eup %598  ;;  %vm1176_vm6 = vcmp.eq.f32.partialorder %v357_v51, 8.507059e+37  ;;  %v341_v31 = vsel %vm1171_vm5, %v1051_v16, %v337_v62  ;;  %v331_v27 = vsel %vm1135_vm8, %v330_v37, %v326_v33 }
  0xc1   :  { %vm369_vm9 = vweird.f32 %v597_v25  ;;  %v461_v44 = vsel %vm460_vm2, %v459_v3, %v457_v45  ;;  %vm398_vm12 = vweird.f32 %v1049_v57  ;;  %v1189_v21 = vadd.f32 1.0, %v599_v40 }
  0xc2   :  { %v366_v13 = vmul.f32 %v597_v25, %v365_v36  ;;  %v465_v38 = vsel %vm464_vm3, %v463_v28, %v461_v44  ;;  %vm468_vm7 = vcmask 523712   ;;  %vm384_vm10 = vweird.f32 %v1100_v58 }
  0xc3   :  { %vm368_vm15 = vweird.f32 %v1082_v39  ;;  %v372_v16 = vand.u32 2147483647, %v1082_v39  ;;  %v374_v46 = vand.u32 2147483648, %v1082_v39  ;;  %v382_v52 = vadd.f32 %v1100_v58, %v381_v35  ;;  %vm1225_vm13 = vmor %vm383_vm4, %vm384_vm10 }
  0xc4   :  { %v367_v51 = vadd.f32 %v597_v25, %v366_v13  ;;  %600 = vrcp.f32 %v1189_v21  ;;  %v478_v34 = vadd.s32 4294967216, %v765_v23  ;;  %v346_v20 = vsel %vm1140_vm11, %v345_v1, %v341_v31  ;;  %vm1202_vm8 = vmor %vm368_vm15, %vm369_vm9 }
  0xc5   :  { %v475_v3 = vperm.slane %v331_v27, %v1047_v15  ;;  %v469_v42 = vsel %vm468_vm7, %v467_v19, %v465_v38  ;;  %vm472_vm0 = vcmask 589312   ;;  %v396_v49 = vmul.f32 %v1122_v10, %v395_v26 }
  0xc6   :  { %v389_v54 = vand.u32 2147483648, %v1033_v24  ;;  %v371_v15 = vsel %vm1202_vm8, %v597_v25, %v367_v51  ;;  %vm476_vm11 = vcmask 654912   ;;  %v356_v14 = vsel %vm1210_vm1, %v1035_v2, %v352_v18 }
  0xc7   :  { %v387_v32 = vand.u32 2147483647, %v1033_v24  ;;  %vm373_vm14 = vcmp.eq.f32.partialorder %v372_v16, 8.507059e+37  ;;  %v375_v59 = vor.u32 1.1754944e-38, %v374_v46  ;;  %v386_v60 = vsel %vm1225_vm13, %v1100_v58, %v382_v52 }
  0xc8   :  { %v473_v2 = vsel %vm472_vm0, %v471_v30, %v469_v42  ;;  %v479_v29 = vperm.slane %v346_v20, %v478_v34  ;;  %v486_v22 = vadd.s32 4294967200, %v765_v23  ;;  %vm480_vm2 = vcmask 720512  }
  0xc9   :  { %v376_v61 = vsel %vm373_vm14, %v375_v59, %v371_v15  ;;  %v477_v63 = vsel %vm476_vm11, %v475_v3, %v473_v2  ;;  %v482_v50 = vadd.s32 4294967208, %v765_v23  ;;  %v390_v24 = vor.u32 1.1754944e-38, %v389_v54 }
  0xca   :  { %v601_v1 = vpop.eup %600  ;;  %v361_v43 = vsel %vm1176_vm6, %v1096_v4, %v356_v14  ;;  %v397_v58 = vadd.f32 %v1122_v10, %v396_v49  ;;  %vm399_vm4 = vweird.f32 %v1122_v10  ;;  %vm388_vm3 = vcmp.eq.f32.partialorder %v387_v32, 8.507059e+37 }
  0xcb   :  { %v409_v55 = vmul.f32 %v601_v1, %v1189_v21  ;;  %v402_v8 = vand.u32 2147483647, %v1049_v57  ;;  %v490_v30 = vadd.s32 4294967192, %v765_v23  ;;  %v391_v9 = vsel %vm388_vm3, %v390_v24, %v386_v60  ;;  %vm1248_vm9 = vmor %vm398_vm12, %vm399_vm4 }
  0xcc   :  { %v481_v5 = vsel %vm480_vm2, %v479_v29, %v477_v63  ;;  %vm484_vm5 = vcmask 786112   ;;  %v487_v6 = vperm.slane %v376_v61, %v486_v22  ;;  %v483_v37 = vperm.slane %v361_v43, %v482_v50 }
  0xcd   :  { %v410_v7 = vsub.f32 1.0, %v409_v55  ;;  %vm488_vm6 = vcmask 851712   ;;  %v401_v12 = vsel %vm1248_vm9, %v1122_v10, %v397_v58  ;;  %v405_v0 = vor.u32 1.1754944e-38, %v404_v48 }
  0xce   :  { %v417_v25 = vand.u32 2147483647, %v1189_v21  ;;  %v419_v19 = vand.u32 2147483648, %v1189_v21  ;;  %vm414_vm7 = vweird.f32 %v601_v1  ;;  %v485_v47 = vsel %vm484_vm5, %v483_v37, %v481_v5 }
  0xcf   :  { %v411_v62 = vmul.f32 %v601_v1, %v410_v7  ;;  %v491_v28 = vperm.slane %v391_v9, %v490_v30  ;;  %vm403_vm12 = vcmp.eq.f32.partialorder %v402_v8, 8.507059e+37  ;;  %v489_v33 = vsel %vm488_vm6, %v487_v6, %v485_v47 }
  0xd0   :  { %vm492_vm10 = vcmask 917312   ;;  %v494_v56 = vadd.s32 4294967184, %v765_v23  ;;  %v406_v45 = vsel %vm403_vm12, %v405_v0, %v401_v12  ;;  %vm413_vm15 = vweird.f32 %v1189_v21 }
  0xd1   :  { %v412_v18 = vadd.f32 %v601_v1, %v411_v62  ;;  %v498_v57 = vadd.s32 4294967176, %v765_v23  ;;  %vm415_vm8 = vmor %vm413_vm15, %vm414_vm7  ;;  %v420_v10 = vor.u32 1.1754944e-38, %v419_v19  ;;  %vm418_vm0 = vcmp.eq.f32.partialorder %v417_v25, 8.507059e+37 }
  0xd2   :  { %v493_v17 = vsel %vm492_vm10, %v491_v28, %v489_v33  ;;  %vm496_vm1 = vcmask 982912   ;;  %v495_v35 = vperm.slane %v406_v45, %v494_v56  ;;  %vm500_vm11 = vcmask 1048512  }
  0xd3   :  { %v416_v48 = vsel %vm415_vm8, %v601_v1, %v412_v18 }
  0xd4   :  { %v421_v26 = vsel %vm418_vm0, %v420_v10, %v416_v48  ;;  %v497_v40 = vsel %vm496_vm1, %v495_v35, %v493_v17 }
  0xd5   :  { %v499_v36 = vperm.slane %v421_v26, %v498_v57 }
  0xd7   :  { %v501_v23 = vsel %vm500_vm11, %v499_v36, %v497_v40 }
  0xd8   :  { %503 = vst [vmem:[#allocation3] sm:$0x1] %v501_v23 }
  0xd9   :  { %514 = dma.vmem_to_hbm [thread:$0]  %s510_s2, 16, %s512_s1, [#allocation4]  }
  0xda   :  { %626 = dma.done.wait [#allocation4], 16  }
  0xdb   :  { %627 = vsyncadd [#allocation4], 4294967280 }
  0xdc   :  { %519 = vsyncpa [#allocation4], 1 }

</bundles_post_ra>
